<compile_context>
chip_gen: v6e
topology: v6e:2x2x1
jax: 0.10.0
libtpu: 0.0.40
codegen_flags: <defaults>
</compile_context>

<pallas_src>
import functools

import jax
import jax.numpy as jnp
from jax.experimental import pallas as pl
from jax.experimental.pallas import tpu as pltpu


# ---------------------------------------------------------------------------
# Kernel: one batch block per grid step, all heads fused.
# ---------------------------------------------------------------------------
def _attention_kernel(x_ref, kv_ref, wq_ref, wkv_ref, wp_ref, b_ref, o_ref, *,
                      num_heads):
    # x_ref:   (Bb, Nx, C)  bf16 query-side tokens for this batch block
    # kv_ref:  (Bb, N,  C)  bf16 key/value-side tokens
    # wq_ref:  (C, C)       bf16 q projection (scale pre-folded), resident
    # wkv_ref: (C, 2C)      bf16 fused k/v projection, resident
    # wp_ref:  (C, C)       bf16 output projection, resident
    # b_ref:   (1, 1, C)    f32 output projection bias
    # o_ref:   (Bb, Nx, C)  output block
    Bb, Nx, C = x_ref.shape
    _, N, _ = kv_ref.shape
    H = num_heads
    hd = C // H

    x2 = x_ref[...].reshape(Bb * Nx, C)      # bf16 (pre-cast in wrapper)
    kv2 = kv_ref[...].reshape(Bb * N, C)     # bf16

    # Fused projections across all heads -> full MXU lane width.
    q = jnp.dot(x2, wq_ref[...], preferred_element_type=jnp.float32)      # (Bb*Nx, C)
    kvp = jnp.dot(kv2, wkv_ref[...], preferred_element_type=jnp.float32)  # (Bb*N, 2C)

    q3 = q.reshape(Bb, Nx, C).astype(jnp.bfloat16)
    k3 = kvp[:, :C].reshape(Bb, N, C).astype(jnp.bfloat16)
    v3 = kvp[:, C:].reshape(Bb, N, C).astype(jnp.bfloat16)

    # Per-head attention (contraction width hd is inherent to MHA).  Softmax
    # math stays in f32 (v5e VPU/EUP has no bf16); approx reciprocal is fine
    # for inference (TODO(synk): use exact divide if this kernel feeds a
    # backward pass).
    ctx_heads = []
    for h in range(H):
        sl = slice(h * hd, (h + 1) * hd)
        qh = q3[:, :, sl]                                                  # (Bb, Nx, hd)
        kh = k3[:, :, sl]                                                  # (Bb, N,  hd)
        vh = v3[:, :, sl]                                                  # (Bb, N,  hd)
        s = jnp.einsum('bqd,bkd->bqk', qh, kh,
                       preferred_element_type=jnp.float32)                # (Bb, Nx, N) f32
        s = s - jnp.max(s, axis=-1, keepdims=True)
        p = jnp.exp(s)
        p = p * pl.reciprocal(jnp.sum(p, axis=-1, keepdims=True), approx=True)
        ctx_heads.append(jnp.einsum('bqk,bkd->bqd', p.astype(jnp.bfloat16), vh,
                                    preferred_element_type=jnp.float32))  # (Bb, Nx, hd)

    ctx = jnp.concatenate(ctx_heads, axis=-1)                              # (Bb, Nx, C) f32
    ctx2 = ctx.reshape(Bb * Nx, C).astype(jnp.bfloat16)

    # Single output projection with K = C (full systolic-array utilization).
    out = jnp.dot(ctx2, wp_ref[...], preferred_element_type=jnp.float32)   # (Bb*Nx, C)
    o_ref[...] = (out.reshape(Bb, Nx, C) + b_ref[...]).astype(o_ref.dtype)


# ---------------------------------------------------------------------------
# Wrapper
# ---------------------------------------------------------------------------
def attention_pallas(x, kv, wq, wkv, wproj, bproj, *, num_heads,
                     block_batch=None):
    Bx, Nx, Cx = x.shape
    B, N, C = kv.shape
    assert Bx == B and Cx == C and C % num_heads == 0
    H = num_heads
    hd = C // H
    scale = hd ** (-0.5)
    out_dtype = x.dtype

    # --- one-time parameter prep ---------------------------------------
    # Fold `scale` into wq (in f32, then cast), keep k/v fused as one weight,
    # cast MXU operands to bf16.
    wq_s = (wq.astype(jnp.float32) * scale).astype(jnp.bfloat16)   # (C, C)
    wkv_b = wkv.astype(jnp.bfloat16)                               # (C, 2C)
    wp_b = wproj.astype(jnp.bfloat16)                              # (C, C)
    b3 = bproj.reshape(1, 1, C).astype(jnp.float32)                # (1, 1, C)

    # --- pre-cast activations to bf16 (halves HBM->VMEM DMA bytes) ------
    x_b = x.astype(jnp.bfloat16)
    kv_b = kv.astype(jnp.bfloat16)

    # --- block sizing from a VMEM budget --------------------------------
    bf16, f32 = 2, 4
    out_sz = jnp.dtype(out_dtype).itemsize
    io_per_b = (2 * Nx * C * bf16        # x block, double-buffered
                + 2 * N * C * bf16       # kv block, double-buffered
                + 2 * Nx * C * out_sz)   # output block, double-buffered
    tmp_per_b = (Nx * C * (f32 + bf16)        # q (f32) + bf16 copy
                 + N * 2 * C * (f32 + bf16)   # kv projection + bf16 k/v copies
                 + 2 * Nx * N * f32           # one head's logits + probs
                 + Nx * C * (f32 + bf16)      # concatenated ctx + bf16 copy
                 + Nx * C * f32)              # projected output before store
    per_b = io_per_b + tmp_per_b
    weight_bytes = (C * C + 2 * C * C + C * C) * bf16 + C * f32

    if block_batch is None:
        budget = 24 << 20   # conservative activation budget across v5e/v6e/v7x
        bb = max(1, min(B, budget // max(per_b, 1)))
        if B >= 2:
            # Keep >= 2 blocks on the parallel axis so both v7x TensorCores get
            # work; the extra grid step is ~0.35us on single-TC v5e/v6e.
            bb = min(bb, max(1, B // 2))
        while B % bb:
            bb -= 1
        block_batch = bb
    Bb = int(block_batch)
    assert B % Bb == 0

    vmem_limit = int(min(48 << 20,
                         max(32 << 20, 2 * (weight_bytes + Bb * per_b))))

    grid = (B // Bb,)
    kernel = functools.partial(_attention_kernel, num_heads=H)

    return pl.pallas_call(
        kernel,
        out_shape=jax.ShapeDtypeStruct((B, Nx, C), out_dtype),
        grid_spec=pltpu.PrefetchScalarGridSpec(
            num_scalar_prefetch=0,
            grid=grid,
            in_specs=[
                pl.BlockSpec((Bb, Nx, C), lambda b: (b, 0, 0)),   # x (bf16)
                pl.BlockSpec((Bb, N, C), lambda b: (b, 0, 0)),    # kv (bf16)
                pl.BlockSpec((C, C), lambda b: (0, 0)),           # wq (resident)
                pl.BlockSpec((C, 2 * C), lambda b: (0, 0)),       # wkv (resident)
                pl.BlockSpec((C, C), lambda b: (0, 0)),           # wproj (resident)
                pl.BlockSpec((1, 1, C), lambda b: (0, 0, 0)),     # bias (resident)
            ],
            out_specs=pl.BlockSpec((Bb, Nx, C), lambda b: (b, 0, 0)),
        ),
        compiler_params=pltpu.CompilerParams(
            dimension_semantics=("parallel",),
            vmem_limit_bytes=vmem_limit),
    )(x_b, kv_b, wq_s, wkv_b, wp_b, b3)


# ---------------------------------------------------------------------------
# Pure-JAX f32 reference (mirrors the PyTorch forward exactly)
# ---------------------------------------------------------------------------
def attention_ref(x, kv, wq, wkv, wproj, bproj, *, num_heads):
    Bx, Nx, C = x.shape
    B, N, _ = kv.shape
    hd = C // num_heads
    scale = hd ** (-0.5)

    q = (x @ wq).reshape(Bx, Nx, num_heads, hd).transpose(0, 2, 1, 3)        # (B,H,Nx,hd)
    kvp = (kv @ wkv).reshape(B, N, 2, num_heads, hd).transpose(2, 0, 3, 1, 4)
    k, v = kvp[0], kvp[1]                                                    # (B,H,N,hd)

    attn = jnp.einsum('bhqd,bhkd->bhqk', q, k) * scale
    attn = jax.nn.softmax(attn, axis=-1)
    out = jnp.einsum('bhqk,bhkd->bhqd', attn, v)                             # (B,H,Nx,hd)
    out = out.transpose(0, 2, 1, 3).reshape(Bx, Nx, C)
    return out @ wproj + bproj


# ---------------------------------------------------------------------------
# Main
# ---------------------------------------------------------------------------
if __name__ == "__main__":
    B = 2          # batch
    Nx = 8         # query sequence length
    N = 8          # key/value sequence length
    C = 32         # dim
    H = 4          # num_heads -> head_dim = 8

    key = jax.random.PRNGKey(0)
    kx, kkv, k1, k2, k3, k4 = jax.random.split(key, 6)

    x = jax.random.normal(kx, (B, Nx, C), dtype=jnp.float32)
    kv = jax.random.normal(kkv, (B, N, C), dtype=jnp.float32)

    # nn.Linear-style uniform init; weights stored pre-transposed as (in, out).
    # q / kv have no bias (qkv_bias=False); proj has a bias.
    bound = 1.0 / (C ** 0.5)
    wq = jax.random.uniform(k1, (C, C), jnp.float32, -bound, bound)
    wkv = jax.random.uniform(k2, (C, 2 * C), jnp.float32, -bound, bound)
    wproj = jax.random.uniform(k3, (C, C), jnp.float32, -bound, bound)
    bproj = jax.random.uniform(k4, (C,), jnp.float32, -bound, bound)

    out = attention_pallas(x, kv, wq, wkv, wproj, bproj, num_heads=H)
    out = jax.block_until_ready(out)

    ref = attention_ref(x, kv, wq, wkv, wproj, bproj, num_heads=H)
    assert out.shape == (B, Nx, C)
    # bf16 MXU operands and bf16 activation I/O -> looser tolerance than f32.
    assert jnp.allclose(out, ref, atol=3e-2, rtol=3e-2), "mismatch vs reference"

    print("KERNEL_OK")
</pallas_src>

<mosaic_0001>
module attributes {stable_mosaic.version = 11 : i64} {
  func.func @_attention_kernel(%arg0: i32, %arg1: memref<1x8x32xbf16, #tpu.memory_space<vmem>>, %arg2: memref<1x8x32xbf16, #tpu.memory_space<vmem>>, %arg3: memref<32x32xbf16, #tpu.memory_space<vmem>>, %arg4: memref<32x64xbf16, #tpu.memory_space<vmem>>, %arg5: memref<32x32xbf16, #tpu.memory_space<vmem>>, %arg6: memref<1x1x32xf32, #tpu.memory_space<vmem>>, %arg7: memref<1x8x32xf32, #tpu.memory_space<vmem>>) attributes {dimension_semantics = [#tpu.dimension_semantics<parallel>], iteration_bounds = array<i64: 2>, scalar_prefetch = 0 : i64, scratch_operands = 0 : i64, tpu.core_type = #tpu.core_type<tc>, window_params = [{transform_indices = @transform_0, window_bounds = array<i64: 1, 8, 32>}, {transform_indices = @transform_1, window_bounds = array<i64: 1, 8, 32>}, {pipeline_mode = #tpu.pipeline_mode<synchronous>, transform_indices = @transform_2, window_bounds = array<i64: 32, 32>}, {pipeline_mode = #tpu.pipeline_mode<synchronous>, transform_indices = @transform_3, window_bounds = array<i64: 32, 64>}, {pipeline_mode = #tpu.pipeline_mode<synchronous>, transform_indices = @transform_4, window_bounds = array<i64: 32, 32>}, {pipeline_mode = #tpu.pipeline_mode<synchronous>, transform_indices = @transform_5, window_bounds = array<i64: 1, 1, 32>}, {transform_indices = @transform_6, window_bounds = array<i64: 1, 8, 32>}]} {
    %c0 = arith.constant 0 : index
    %c0_0 = arith.constant 0 : index
    %c0_1 = arith.constant 0 : index
    %0 = vector.load %arg1[%c0, %c0_0, %c0_1] : memref<1x8x32xbf16, #tpu.memory_space<vmem>>, vector<1x8x32xbf16>
    %1 = vector.shape_cast %0 : vector<1x8x32xbf16> to vector<8x32xbf16>
    %c0_2 = arith.constant 0 : index
    %c0_3 = arith.constant 0 : index
    %c0_4 = arith.constant 0 : index
    %2 = vector.load %arg2[%c0_2, %c0_3, %c0_4] : memref<1x8x32xbf16, #tpu.memory_space<vmem>>, vector<1x8x32xbf16>
    %3 = vector.shape_cast %2 : vector<1x8x32xbf16> to vector<8x32xbf16>
    %c0_5 = arith.constant 0 : index
    %c0_6 = arith.constant 0 : index
    %4 = vector.load %arg3[%c0_5, %c0_6] : memref<32x32xbf16, #tpu.memory_space<vmem>>, vector<32x32xbf16>
    %cst = arith.constant dense<0.000000e+00> : vector<8x32xf32>
    %5 = tpu.matmul %1, %4, %cst {dimension_numbers = #tpu.dot_dimension_numbers<[1], [0], [0], [1], [0, 0, 1, 1], [], []>} : vector<8x32xbf16>, vector<32x32xbf16>, vector<8x32xf32> -> vector<8x32xf32>
    %c0_7 = arith.constant 0 : index
    %c0_8 = arith.constant 0 : index
    %6 = vector.load %arg4[%c0_7, %c0_8] : memref<32x64xbf16, #tpu.memory_space<vmem>>, vector<32x64xbf16>
    %cst_9 = arith.constant dense<0.000000e+00> : vector<8x64xf32>
    %7 = tpu.matmul %3, %6, %cst_9 {dimension_numbers = #tpu.dot_dimension_numbers<[1], [0], [0], [1], [0, 0, 1, 1], [], []>} : vector<8x32xbf16>, vector<32x64xbf16>, vector<8x64xf32> -> vector<8x64xf32>
    %8 = vector.shape_cast %5 : vector<8x32xf32> to vector<1x8x32xf32>
    %9 = arith.truncf %8 : vector<1x8x32xf32> to vector<1x8x32xbf16>
    %10 = vector.extract_strided_slice %7 {offsets = [0, 0], sizes = [8, 32], strides = [1, 1]} : vector<8x64xf32> to vector<8x32xf32>
    %11 = vector.shape_cast %10 : vector<8x32xf32> to vector<1x8x32xf32>
    %12 = arith.truncf %11 : vector<1x8x32xf32> to vector<1x8x32xbf16>
    %13 = vector.extract_strided_slice %7 {offsets = [0, 32], sizes = [8, 32], strides = [1, 1]} : vector<8x64xf32> to vector<8x32xf32>
    %14 = vector.shape_cast %13 : vector<8x32xf32> to vector<1x8x32xf32>
    %15 = arith.truncf %14 : vector<1x8x32xf32> to vector<1x8x32xbf16>
    %16 = vector.extract_strided_slice %9 {offsets = [0, 0, 0], sizes = [1, 8, 8], strides = [1, 1, 1]} : vector<1x8x32xbf16> to vector<1x8x8xbf16>
    %17 = vector.extract_strided_slice %12 {offsets = [0, 0, 0], sizes = [1, 8, 8], strides = [1, 1, 1]} : vector<1x8x32xbf16> to vector<1x8x8xbf16>
    %18 = vector.extract_strided_slice %15 {offsets = [0, 0, 0], sizes = [1, 8, 8], strides = [1, 1, 1]} : vector<1x8x32xbf16> to vector<1x8x8xbf16>
    "tpu.trace_start"() <{level = 10 : i32, message = "bqd,bkd->bqk"}> : () -> ()
    %cst_10 = arith.constant dense<0.000000e+00> : vector<1x8x8xf32>
    %19 = tpu.matmul %16, %17, %cst_10 {dimension_numbers = #tpu.dot_dimension_numbers<[2], [2], [1], [1], [0, 0, 0, 1, 1, 1], [0], [0]>} : vector<1x8x8xbf16>, vector<1x8x8xbf16>, vector<1x8x8xf32> -> vector<1x8x8xf32>
    "tpu.trace_stop"() : () -> ()
    %cst_11 = arith.constant dense<0xFF800000> : vector<1x8xf32>
    %20 = vector.multi_reduction <maximumf>, %19, %cst_11 [2] : vector<1x8x8xf32> to vector<1x8xf32>
    %21 = vector.shape_cast %20 : vector<1x8xf32> to vector<1x8x1xf32>
    %22 = vector.broadcast %21 : vector<1x8x1xf32> to vector<1x8x8xf32>
    %23 = arith.subf %19, %22 : vector<1x8x8xf32>
    %24 = math.exp %23 : vector<1x8x8xf32>
    %cst_12 = arith.constant dense<0.000000e+00> : vector<1x8xf32>
    %25 = vector.multi_reduction <add>, %24, %cst_12 [2] : vector<1x8x8xf32> to vector<1x8xf32>
    %26 = vector.shape_cast %25 : vector<1x8xf32> to vector<1x8x1xf32>
    %27 = tpu.reciprocal %26 {approx = true} : vector<1x8x1xf32> -> vector<1x8x1xf32>
    %28 = vector.broadcast %27 : vector<1x8x1xf32> to vector<1x8x8xf32>
    %29 = arith.mulf %24, %28 : vector<1x8x8xf32>
    %30 = arith.truncf %29 : vector<1x8x8xf32> to vector<1x8x8xbf16>
    "tpu.trace_start"() <{level = 10 : i32, message = "bqk,bkd->bqd"}> : () -> ()
    %cst_13 = arith.constant dense<0.000000e+00> : vector<1x8x8xf32>
    %31 = tpu.matmul %30, %18, %cst_13 {dimension_numbers = #tpu.dot_dimension_numbers<[2], [1], [1], [2], [0, 0, 0, 1, 1, 2], [0], [0]>} : vector<1x8x8xbf16>, vector<1x8x8xbf16>, vector<1x8x8xf32> -> vector<1x8x8xf32>
    "tpu.trace_stop"() : () -> ()
    %32 = vector.extract_strided_slice %9 {offsets = [0, 0, 8], sizes = [1, 8, 8], strides = [1, 1, 1]} : vector<1x8x32xbf16> to vector<1x8x8xbf16>
    %33 = vector.extract_strided_slice %12 {offsets = [0, 0, 8], sizes = [1, 8, 8], strides = [1, 1, 1]} : vector<1x8x32xbf16> to vector<1x8x8xbf16>
    %34 = vector.extract_strided_slice %15 {offsets = [0, 0, 8], sizes = [1, 8, 8], strides = [1, 1, 1]} : vector<1x8x32xbf16> to vector<1x8x8xbf16>
    "tpu.trace_start"() <{level = 10 : i32, message = "bqd,bkd->bqk"}> : () -> ()
    %cst_14 = arith.constant dense<0.000000e+00> : vector<1x8x8xf32>
    %35 = tpu.matmul %32, %33, %cst_14 {dimension_numbers = #tpu.dot_dimension_numbers<[2], [2], [1], [1], [0, 0, 0, 1, 1, 1], [0], [0]>} : vector<1x8x8xbf16>, vector<1x8x8xbf16>, vector<1x8x8xf32> -> vector<1x8x8xf32>
    "tpu.trace_stop"() : () -> ()
    %cst_15 = arith.constant dense<0xFF800000> : vector<1x8xf32>
    %36 = vector.multi_reduction <maximumf>, %35, %cst_15 [2] : vector<1x8x8xf32> to vector<1x8xf32>
    %37 = vector.shape_cast %36 : vector<1x8xf32> to vector<1x8x1xf32>
    %38 = vector.broadcast %37 : vector<1x8x1xf32> to vector<1x8x8xf32>
    %39 = arith.subf %35, %38 : vector<1x8x8xf32>
    %40 = math.exp %39 : vector<1x8x8xf32>
    %cst_16 = arith.constant dense<0.000000e+00> : vector<1x8xf32>
    %41 = vector.multi_reduction <add>, %40, %cst_16 [2] : vector<1x8x8xf32> to vector<1x8xf32>
    %42 = vector.shape_cast %41 : vector<1x8xf32> to vector<1x8x1xf32>
    %43 = tpu.reciprocal %42 {approx = true} : vector<1x8x1xf32> -> vector<1x8x1xf32>
    %44 = vector.broadcast %43 : vector<1x8x1xf32> to vector<1x8x8xf32>
    %45 = arith.mulf %40, %44 : vector<1x8x8xf32>
    %46 = arith.truncf %45 : vector<1x8x8xf32> to vector<1x8x8xbf16>
    "tpu.trace_start"() <{level = 10 : i32, message = "bqk,bkd->bqd"}> : () -> ()
    %cst_17 = arith.constant dense<0.000000e+00> : vector<1x8x8xf32>
    %47 = tpu.matmul %46, %34, %cst_17 {dimension_numbers = #tpu.dot_dimension_numbers<[2], [1], [1], [2], [0, 0, 0, 1, 1, 2], [0], [0]>} : vector<1x8x8xbf16>, vector<1x8x8xbf16>, vector<1x8x8xf32> -> vector<1x8x8xf32>
    "tpu.trace_stop"() : () -> ()
    %48 = vector.extract_strided_slice %9 {offsets = [0, 0, 16], sizes = [1, 8, 8], strides = [1, 1, 1]} : vector<1x8x32xbf16> to vector<1x8x8xbf16>
    %49 = vector.extract_strided_slice %12 {offsets = [0, 0, 16], sizes = [1, 8, 8], strides = [1, 1, 1]} : vector<1x8x32xbf16> to vector<1x8x8xbf16>
    %50 = vector.extract_strided_slice %15 {offsets = [0, 0, 16], sizes = [1, 8, 8], strides = [1, 1, 1]} : vector<1x8x32xbf16> to vector<1x8x8xbf16>
    "tpu.trace_start"() <{level = 10 : i32, message = "bqd,bkd->bqk"}> : () -> ()
    %cst_18 = arith.constant dense<0.000000e+00> : vector<1x8x8xf32>
    %51 = tpu.matmul %48, %49, %cst_18 {dimension_numbers = #tpu.dot_dimension_numbers<[2], [2], [1], [1], [0, 0, 0, 1, 1, 1], [0], [0]>} : vector<1x8x8xbf16>, vector<1x8x8xbf16>, vector<1x8x8xf32> -> vector<1x8x8xf32>
    "tpu.trace_stop"() : () -> ()
    %cst_19 = arith.constant dense<0xFF800000> : vector<1x8xf32>
    %52 = vector.multi_reduction <maximumf>, %51, %cst_19 [2] : vector<1x8x8xf32> to vector<1x8xf32>
    %53 = vector.shape_cast %52 : vector<1x8xf32> to vector<1x8x1xf32>
    %54 = vector.broadcast %53 : vector<1x8x1xf32> to vector<1x8x8xf32>
    %55 = arith.subf %51, %54 : vector<1x8x8xf32>
    %56 = math.exp %55 : vector<1x8x8xf32>
    %cst_20 = arith.constant dense<0.000000e+00> : vector<1x8xf32>
    %57 = vector.multi_reduction <add>, %56, %cst_20 [2] : vector<1x8x8xf32> to vector<1x8xf32>
    %58 = vector.shape_cast %57 : vector<1x8xf32> to vector<1x8x1xf32>
    %59 = tpu.reciprocal %58 {approx = true} : vector<1x8x1xf32> -> vector<1x8x1xf32>
    %60 = vector.broadcast %59 : vector<1x8x1xf32> to vector<1x8x8xf32>
    %61 = arith.mulf %56, %60 : vector<1x8x8xf32>
    %62 = arith.truncf %61 : vector<1x8x8xf32> to vector<1x8x8xbf16>
    "tpu.trace_start"() <{level = 10 : i32, message = "bqk,bkd->bqd"}> : () -> ()
    %cst_21 = arith.constant dense<0.000000e+00> : vector<1x8x8xf32>
    %63 = tpu.matmul %62, %50, %cst_21 {dimension_numbers = #tpu.dot_dimension_numbers<[2], [1], [1], [2], [0, 0, 0, 1, 1, 2], [0], [0]>} : vector<1x8x8xbf16>, vector<1x8x8xbf16>, vector<1x8x8xf32> -> vector<1x8x8xf32>
    "tpu.trace_stop"() : () -> ()
    %64 = vector.extract_strided_slice %9 {offsets = [0, 0, 24], sizes = [1, 8, 8], strides = [1, 1, 1]} : vector<1x8x32xbf16> to vector<1x8x8xbf16>
    %65 = vector.extract_strided_slice %12 {offsets = [0, 0, 24], sizes = [1, 8, 8], strides = [1, 1, 1]} : vector<1x8x32xbf16> to vector<1x8x8xbf16>
    %66 = vector.extract_strided_slice %15 {offsets = [0, 0, 24], sizes = [1, 8, 8], strides = [1, 1, 1]} : vector<1x8x32xbf16> to vector<1x8x8xbf16>
    "tpu.trace_start"() <{level = 10 : i32, message = "bqd,bkd->bqk"}> : () -> ()
    %cst_22 = arith.constant dense<0.000000e+00> : vector<1x8x8xf32>
    %67 = tpu.matmul %64, %65, %cst_22 {dimension_numbers = #tpu.dot_dimension_numbers<[2], [2], [1], [1], [0, 0, 0, 1, 1, 1], [0], [0]>} : vector<1x8x8xbf16>, vector<1x8x8xbf16>, vector<1x8x8xf32> -> vector<1x8x8xf32>
    "tpu.trace_stop"() : () -> ()
    %cst_23 = arith.constant dense<0xFF800000> : vector<1x8xf32>
    %68 = vector.multi_reduction <maximumf>, %67, %cst_23 [2] : vector<1x8x8xf32> to vector<1x8xf32>
    %69 = vector.shape_cast %68 : vector<1x8xf32> to vector<1x8x1xf32>
    %70 = vector.broadcast %69 : vector<1x8x1xf32> to vector<1x8x8xf32>
    %71 = arith.subf %67, %70 : vector<1x8x8xf32>
    %72 = math.exp %71 : vector<1x8x8xf32>
    %cst_24 = arith.constant dense<0.000000e+00> : vector<1x8xf32>
    %73 = vector.multi_reduction <add>, %72, %cst_24 [2] : vector<1x8x8xf32> to vector<1x8xf32>
    %74 = vector.shape_cast %73 : vector<1x8xf32> to vector<1x8x1xf32>
    %75 = tpu.reciprocal %74 {approx = true} : vector<1x8x1xf32> -> vector<1x8x1xf32>
    %76 = vector.broadcast %75 : vector<1x8x1xf32> to vector<1x8x8xf32>
    %77 = arith.mulf %72, %76 : vector<1x8x8xf32>
    %78 = arith.truncf %77 : vector<1x8x8xf32> to vector<1x8x8xbf16>
    "tpu.trace_start"() <{level = 10 : i32, message = "bqk,bkd->bqd"}> : () -> ()
    %cst_25 = arith.constant dense<0.000000e+00> : vector<1x8x8xf32>
    %79 = tpu.matmul %78, %66, %cst_25 {dimension_numbers = #tpu.dot_dimension_numbers<[2], [1], [1], [2], [0, 0, 0, 1, 1, 2], [0], [0]>} : vector<1x8x8xbf16>, vector<1x8x8xbf16>, vector<1x8x8xf32> -> vector<1x8x8xf32>
    "tpu.trace_stop"() : () -> ()
    %80 = tpu.concatenate %31, %47, %63, %79 in 2 : vector<1x8x8xf32>, vector<1x8x8xf32>, vector<1x8x8xf32>, vector<1x8x8xf32> -> vector<1x8x32xf32>
    %81 = vector.shape_cast %80 : vector<1x8x32xf32> to vector<8x32xf32>
    %82 = arith.truncf %81 : vector<8x32xf32> to vector<8x32xbf16>
    %c0_26 = arith.constant 0 : index
    %c0_27 = arith.constant 0 : index
    %83 = vector.load %arg5[%c0_26, %c0_27] : memref<32x32xbf16, #tpu.memory_space<vmem>>, vector<32x32xbf16>
    %cst_28 = arith.constant dense<0.000000e+00> : vector<8x32xf32>
    %84 = tpu.matmul %82, %83, %cst_28 {dimension_numbers = #tpu.dot_dimension_numbers<[1], [0], [0], [1], [0, 0, 1, 1], [], []>} : vector<8x32xbf16>, vector<32x32xbf16>, vector<8x32xf32> -> vector<8x32xf32>
    %85 = vector.shape_cast %84 : vector<8x32xf32> to vector<1x8x32xf32>
    %c0_29 = arith.constant 0 : index
    %c0_30 = arith.constant 0 : index
    %c0_31 = arith.constant 0 : index
    %86 = vector.load %arg6[%c0_29, %c0_30, %c0_31] : memref<1x1x32xf32, #tpu.memory_space<vmem>>, vector<1x1x32xf32>
    %87 = vector.broadcast %86 : vector<1x1x32xf32> to vector<1x8x32xf32>
    %88 = arith.addf %85, %87 : vector<1x8x32xf32>
    %c0_32 = arith.constant 0 : index
    %c0_33 = arith.constant 0 : index
    %c0_34 = arith.constant 0 : index
    %89 = vector.load %arg7[%c0_32, %c0_33, %c0_34] : memref<1x8x32xf32, #tpu.memory_space<vmem>>, vector<1x8x32xf32>
    tpu.vector_store %arg7[%c0_32, %c0_33, %c0_34], %88 {strides = array<i32>} : memref<1x8x32xf32, #tpu.memory_space<vmem>>, vector<1x8x32xf32>,
    return
  }
  func.func @transform_0(%arg0: i32) -> (i32, i32, i32) {
    %c0_i32 = arith.constant 0 : i32
    %c0_i32_0 = arith.constant 0 : i32
    %c0_i32_1 = arith.constant 0 : i32
    return %arg0, %c0_i32, %c0_i32_0 : i32, i32, i32
  }
  func.func @transform_1(%arg0: i32) -> (i32, i32, i32) {
    %c0_i32 = arith.constant 0 : i32
    %c0_i32_0 = arith.constant 0 : i32
    %c0_i32_1 = arith.constant 0 : i32
    return %arg0, %c0_i32, %c0_i32_0 : i32, i32, i32
  }
  func.func @transform_2(%arg0: i32) -> (i32, i32) {
    %c0_i32 = arith.constant 0 : i32
    %c0_i32_0 = arith.constant 0 : i32
    %c0_i32_1 = arith.constant 0 : i32
    return %c0_i32, %c0_i32_0 : i32, i32
  }
  func.func @transform_3(%arg0: i32) -> (i32, i32) {
    %c0_i32 = arith.constant 0 : i32
    %c0_i32_0 = arith.constant 0 : i32
    %c0_i32_1 = arith.constant 0 : i32
    return %c0_i32, %c0_i32_0 : i32, i32
  }
  func.func @transform_4(%arg0: i32) -> (i32, i32) {
    %c0_i32 = arith.constant 0 : i32
    %c0_i32_0 = arith.constant 0 : i32
    %c0_i32_1 = arith.constant 0 : i32
    return %c0_i32, %c0_i32_0 : i32, i32
  }
  func.func @transform_5(%arg0: i32) -> (i32, i32, i32) {
    %c0_i32 = arith.constant 0 : i32
    %c0_i32_0 = arith.constant 0 : i32
    %c0_i32_1 = arith.constant 0 : i32
    %c0_i32_2 = arith.constant 0 : i32
    return %c0_i32, %c0_i32_0, %c0_i32_1 : i32, i32, i32
  }
  func.func @transform_6(%arg0: i32) -> (i32, i32, i32) {
    %c0_i32 = arith.constant 0 : i32
    %c0_i32_0 = arith.constant 0 : i32
    %c0_i32_1 = arith.constant 0 : i32
    return %arg0, %c0_i32, %c0_i32_0 : i32, i32, i32
  }
}

</mosaic_0001>

<bundles_post_ra>
// kernel: tpu_custom_call.1
= control target key start
LH: loop header
LB: loop body
LE: loop exit
PB: predicated region body
PF: predicated region fallthrough
CT: control target
= control target key end

     0   :  { %s1960_s0 = inlined_call_operand.hbm [shape: bf16[2,8,32], index: 0, kind: input, shape index: {}]   ;;  %s1961_s1 = inlined_call_operand.hbm [shape: bf16[2,8,32], index: 1, kind: input, shape index: {}]   ;;  %s1962_s2 = inlined_call_operand.hbm [shape: bf16[32,32], index: 2, kind: input, shape index: {}]   ;;  %s1963_s3 = inlined_call_operand.hbm [shape: bf16[32,64], index: 3, kind: input, shape index: {}]   ;;  %s1964_s4 = inlined_call_operand.hbm [shape: bf16[32,32], index: 4, kind: input, shape index: {}]   ;;  %s1965_s5 = inlined_call_operand.vmem [shape: f32[1,1,32], index: 5, kind: input, shape index: {}]   ;;  %s1966_s6 = inlined_call_operand.hbm [shape: f32[2,8,32], index: 6, kind: output, shape index: {}]  }
   0x1   :  { %1971 = sst [smem:[#allocation17_spill]] %s1962_s2 }
   0x2   :  { %1972 = sst [smem:[#allocation18_spill]] %s1963_s3 }
   0x3   :  { %1973 = sst [smem:[#allocation19_spill]] %s1964_s4 }
   0x4   :  { %11 = vsyncpa [#allocation3], 0 }
   0x5   :  { %13 = vsyncpa [#allocation3 + $0x1], 0 }
   0x6   :  { %14 = vsyncpa [#allocation6], 0 }
   0x7   :  { %16 = vsyncpa [#allocation6 + $0x1], 0 }
   0x8   :  { %17 = vsyncpa [#allocation9], 0 }
   0x9   :  { %18 = vsyncpa [#allocation4], 0 }
   0xa   :  { %20 = vsyncpa [#allocation4 + $0x1], 0  ;;  %s1653_s21 = smov 0   ;;  %s1655_s22 = smov 0  }
   0xb   :  { %s1657_s23 = smov 0   ;;  %s1659_s24 = smov 0  }
   0xc LB: > { %s1674_s25 = sadd.s32 4294967295, %s1596_s24   ;;  %s1132_s26 = sadd.s32 4294967294, %s1596_s24   ;;  %s1596_s24 = sphi %s1659_s24, %s1996_s24   ;;  %s1592_s23 = sphi %s1657_s23, %s1995_s23   ;;  %s1588_s22 = sphi %s1655_s22, %s1994_s22   ;;  %s1584_s21 = sphi %s1653_s21, %s1993_s21  }
   0xd   : > { %p46_p0 = scmp.ne.s32.totalorder %s1588_s22, %s1584_s21  ;;  %p1967_p1 = scmp.eq.s32.totalorder %s1674_s25, 0 }
   0xe   : > { %p186_p3 = scmp.eq.s32.totalorder %s1132_s26, 1  ;;  %p1133_p5 = scmp.ge.s32.totalorder %s1596_s24, 1 }
   0xf   : > { %p1683_p4 = por %p1967_p1, %p46_p0  ;;  %p193_p7 = scmp.lt.s32.totalorder %s1596_s24, 3 }
  0x10   : > { %p1688_p6 = por %p186_p3, %p46_p0  ;;  %s1598_s30 = smov [#allocation7]  }
  0x11   : > { %s1974_s27 = scalar_select %p1683_p4, 1, 0 }
  0x12   : > { %s1975_s28 = scalar_select %p1688_p6, 1, 0 }
  0x13   : > { %p1693_p8 = pnand %p1133_p5, %p193_p7  ;;  %s205_s7 = sshll.u32 %s1598_s30, 4  ;;  %s206_s7 = int_to_ptr.vmem [resolvable:$true] %s205_s7 }
  0x14   : > { %s1599_s9 = smov [#allocation8]   ;;  %s1600_s11 = smov [#allocation10]  }
  0x15   : > { %s1976_s29 = scalar_select %p1693_p8, 1, 0 }
  0x16   : > { %p1286_p9 = pneg %p1693_p8  ;;  %s218_s10 = sshll.u32 %s1599_s9, 4  ;;  %s219_s10 = int_to_ptr.vmem [resolvable:$true] %s218_s10 }
  0x17   : > { %s231_s12 = sshll.u32 %s1600_s11, 4  ;;  %s1397_s13 = scalar_lea.vmem %s206_s7, 256  ;;  %s232_s12 = int_to_ptr.vmem [resolvable:$true] %s231_s12 }
  0x18   : > { %p1702_p11 = pnand %p1286_p9, %p1967_p1  ;;  %p1398_p13 = scmp.ne.s32.totalorder %s206_s7, %s1397_s13 }
  0x19   : > { %p1405_p5 = scmp.lt.s32.totalorder %s206_s7, %s206_s7  ;;  %p1406_p7 = scmp.lt.s32.totalorder %s1397_s13, %s1397_s13 }
  0x1a   : > { %p1388_p12 = pneg %p1702_p11 }
  0x1b   : > { %p1407_p9 = por %p1406_p7, %p1405_p5 }
  0x1c   : > { %p1400_p0 = pnand %p1398_p13, %p1388_p12 }
  0x1e   : > { %p1401_p3 = pneg %p1400_p0 }
  0x20   : > { %p1408_p10 = pnand %p1407_p9, %p1401_p3 }
  0x22   : > { %1411 = shalt.err (!%p1408_p10)
}
  0x23   : > { %s1601_s14 = smov 64   ;;  %s1602_s15 = smov 4  }
  0x24   : > { %s1978_s2 = sld [smem:[#allocation17_spill]]  ;;  %s1423_s18 = scalar_lea.vmem %s219_s10, 256 }
  0x25   : > { %p1424_p1 = scmp.ne.s32.totalorder %s219_s10, %s1423_s18  ;;  %p1431_p2 = scmp.lt.s32.totalorder %s219_s10, %s219_s10 }
  0x26   : > { %p1432_p6 = scmp.lt.s32.totalorder %s1423_s18, %s1423_s18 }
  0x27   : > { %p1426_p13 = pnand %p1424_p1, %p1388_p12 }
  0x28   : > { %p1433_p5 = por %p1432_p6, %p1431_p2 }
  0x29   : > { %p1427_p0 = pneg %p1426_p13 }
  0x2a   : > { %1289 = dma.hbm_to_vmem [thread:$0]  (!%p1702_p11), %s1978_s2, 256, %s206_s7, [#allocation6], %s1601_s14, %s1601_s14, %s1602_s15  }
  0x2b   : > { %p1434_p3 = pnand %p1433_p5, %p1427_p0 }
  0x2d   : > { %1437 = shalt.err (!%p1434_p3)
}
  0x2e   : > { %s1979_s3 = sld [smem:[#allocation18_spill]]  ;;  %s1449_s26 = scalar_lea.vmem %s232_s12, 256 }
  0x2f   : > { %p1450_p10 = scmp.ne.s32.totalorder %s232_s12, %s1449_s26  ;;  %p1457_p9 = scmp.lt.s32.totalorder %s232_s12, %s232_s12 }
  0x30   : > { %p1458_p13 = scmp.lt.s32.totalorder %s1449_s26, %s1449_s26 }
  0x31   : > { %p1452_p7 = pnand %p1450_p10, %p1388_p12 }
  0x32   : > { %p1459_p4 = por %p1458_p13, %p1457_p9 }
  0x33   : > { %p1453_p1 = pneg %p1452_p7 }
  0x34   : > { %1292 = dma.hbm_to_vmem [thread:$0]  (!%p1702_p11), %s1979_s3, 256, %s219_s10, [#allocation9], %s1601_s14, %s1601_s14, %s1602_s15  }
  0x35   : > { %p1460_p2 = pnand %p1459_p4, %p1453_p1 }
  0x37   : > { %1463 = shalt.err (!%p1460_p2)
}
  0x38   : > { %s1980_s4 = sld [smem:[#allocation19_spill]]  ;;  %s1733_s9 = sadd.s32 1, %s1596_s24  }
  0x39   : > { %s30_s10 = ssub.s32 %s1596_s24, %s1733_s9  ;;  %s33_s8 = sadd.s32 1, %s1592_s23 }
  0x3a   : > { %p31_p4 = scmp.eq.s32.totalorder %s30_s10, 0  ;;  %p40_p6 = scmp.ne.s32.totalorder %s1592_s23, %s1588_s22 }
  0x3b   : > { %p41_p12 = scmp.eq.s32.totalorder %s1596_s24, 0  ;;  %p1310_p0 = scmp.lt.s32.totalorder %s1596_s24, 2 }
  0x3c   : > { %s1743_s11 = scalar_select %p31_p4, %s1592_s23, %s33_s8  }
  0x3d   : > { %p42_p5 = por %p41_p12, %p40_p6  ;;  %p1981_p3 = scmp.eq.s32.totalorder %s1674_s25, 1 }
  0x3e   : > { %1295 = dma.hbm_to_vmem [thread:$0]  (!%p1702_p11), %s1980_s4, 256, %s232_s12, [#allocation9], %s1601_s14, %s1601_s14, %s1602_s15  }
  0x3f   : > { %p1747_p10 = por %p1981_p3, %p40_p6  ;;  %s248_s16 = sand.u32 1, %s1592_s23  }
  0x40   : > { %s1139_s17 = sshll.u32 %s1596_s24, 6  ;;  %s1753_s12 = sshll.u32 %s248_s16, 2 }
  0x41   : > { %s1982_s13 = scalar_select %p1747_p10, 1, 0 }
  0x42   : > { %s1758_s18 = scalar_lea.hbm %s1960_s0, %s1139_s17  ;;  %s252_s19 = scalar_lea.vmem [#allocation2], %s1753_s12 }
  0x43   : > { %s259_s20 = sshll.u32 %s252_s19, 4  ;;  %p1761_p11 = pnand %p1310_p0, %p42_p5  ;;  %s260_s20 = int_to_ptr.vmem [resolvable:$true] %s259_s20 }
  0x44   : > { %s1768_s10 = scalar_lea.hbm %s1961_s1, %s1139_s17  ;;  %s249_s8 = scalar_lea.sflag [#allocation3], %s248_s16 }
  0x45   : > { %s1464_s14 = scalar_lea.hbm %s1758_s18, 64  ;;  %p1466_p1 = pneg %p1761_p11 }
  0x46   : > { %p1465_p7 = scmp.ne.s32.totalorder %s1758_s18, %s1464_s14  ;;  %s1469_s2 = scalar_lea.hbm %s1960_s0, 128 }
  0x47   : > { %p1470_p2 = scmp.lt.s32.totalorder %s1758_s18, %s1960_s0  ;;  %p1471_p4 = scmp.lt.s32.totalorder %s1469_s2, %s1464_s14 }
  0x48   : > { %p1467_p9 = pnand %p1466_p1, %p1465_p7 }
  0x49   : > { %p1472_p6 = por %p1471_p4, %p1470_p2 }
  0x4a   : > { %p1468_p13 = pneg %p1467_p9 }
  0x4c   : > { %p1473_p12 = pnand %p1472_p6, %p1468_p13 }
  0x4e   : > { %1476 = shalt.err (!%p1473_p12)
}
  0x4f   : > { %s1477_s16 = scalar_lea.vmem %s260_s20, 64  ;;  %s1603_s17 = smov [#allocation2]  }
  0x50   : > { %p1478_p0 = scmp.ne.s32.totalorder %s260_s20, %s1477_s16  ;;  %s1482_s30 = sshll.u32 %s1603_s17, 4  ;;  %s1483_s30 = int_to_ptr.vmem [resolvable:$false] %s1482_s30 }
  0x51   : > { %s1484_s7 = scalar_lea.vmem %s1483_s30, 128  ;;  %p1485_p7 = scmp.lt.s32.totalorder %s260_s20, %s1483_s30 }
  0x52   : > { %p1480_p5 = pnand %p1478_p0, %p1466_p1  ;;  %p1486_p9 = scmp.lt.s32.totalorder %s1484_s7, %s1477_s16 }
  0x54   : > { %p1481_p3 = pneg %p1480_p5  ;;  %p1487_p10 = por %p1486_p9, %p1485_p7 }
  0x56   : > { %p1488_p8 = pnand %p1487_p10, %p1481_p3 }
  0x58   : > { %1491 = shalt.err (!%p1488_p8)
}
  0x59   : > { %1299 = dma.hbm_to_vmem [thread:$0]  (!%p1761_p11), %s1758_s18, 64, %s260_s20, %s249_s8  }
  0x5a   : > { %s266_s2 = sand.u32 1, %s1596_s24   ;;  %s270_s3 = scalar_lea.vmem [#allocation5], %s1753_s12 }
  0x5b   : > { %s277_s4 = sshll.u32 %s270_s3, 4  ;;  %s267_s14 = scalar_lea.sflag [#allocation6], %s266_s2  ;;  %s278_s4 = int_to_ptr.vmem [resolvable:$true] %s277_s4 }
  0x5c   : > { %s1492_s15 = scalar_lea.hbm %s1768_s10, 64  ;;  %s1497_s17 = scalar_lea.hbm %s1961_s1, 128 }
  0x5d   : > { %p1493_p13 = scmp.ne.s32.totalorder %s1768_s10, %s1492_s15  ;;  %p1498_p2 = scmp.lt.s32.totalorder %s1768_s10, %s1961_s1 }
  0x5e   : > { %p1499_p4 = scmp.lt.s32.totalorder %s1497_s17, %s1492_s15 }
  0x5f   : > { %p1495_p8 = pnand %p1493_p13, %p1466_p1 }
  0x60   : > { %p1500_p6 = por %p1499_p4, %p1498_p2 }
  0x61   : > { %p1496_p10 = pneg %p1495_p8 }
  0x63   : > { %p1501_p12 = pnand %p1500_p6, %p1496_p10 }
  0x65   : > { %1504 = shalt.err (!%p1501_p12)
}
  0x66   : > { %s1505_s12 = scalar_lea.vmem %s278_s4, 64  ;;  %s1604_s18 = smov [#allocation5]  }
  0x67   : > { %p1506_p0 = scmp.ne.s32.totalorder %s278_s4, %s1505_s12  ;;  %s1510_s20 = sshll.u32 %s1604_s18, 4  ;;  %s1511_s20 = int_to_ptr.vmem [resolvable:$false] %s1510_s20 }
  0x68   : > { %s1512_s8 = scalar_lea.vmem %s1511_s20, 128  ;;  %p1513_p7 = scmp.lt.s32.totalorder %s278_s4, %s1511_s20 }
  0x69   : > { %p1508_p5 = pnand %p1506_p0, %p1466_p1  ;;  %p1514_p9 = scmp.lt.s32.totalorder %s1512_s8, %s1505_s12 }
  0x6b   : > { %p1509_p3 = pneg %p1508_p5  ;;  %p1515_p13 = por %p1514_p9, %p1513_p7 }
  0x6d   : > { %p1516_p8 = pnand %p1515_p13, %p1509_p3 }
  0x6f   : > { %1519 = shalt.err (!%p1516_p8)
}
  0x70   : > { %1302 = dma.hbm_to_vmem [thread:$0]  (!%p1761_p11), %s1768_s10, 64, %s278_s4, %s267_s14  }
  0x71   : > { %p1984_p10 = scmp.ne.s32.totalorder %s1976_s29, 0 }
  0x72   : > { %s1813_s2 = sand.u32 (!%p1984_p10), 1, %s1588_s22   ;;  %p1985_p1 = scmp.ne.s32.totalorder (!%p1984_p10), %s1974_s27, 0 }
  0x73   : > { %286 = sbr.rel (%p1984_p10) target bundleno = 1508 (0x5e4), region = 44  ;;  %s1143_s3 = sshll.u32 (!%p1984_p10), %s1813_s2, 2 }
  0x74   : > { %s289_s15 = scalar_lea.sflag (!%p1984_p10), [#allocation3], %s1813_s2  ;;  %s292_s19 = scalar_lea.vmem (!%p1984_p10), [#allocation2], %s1143_s3 }
  0x78   : > { %1563 = dma.done.wait (%p1985_p1), %s289_s15, 64  }
  0x79   : > { %1565 = vsyncadd (%p1985_p1), %s289_s15, 4294967232  ;;  %s297_s26 = sand.u32 1, %s1674_s25   ;;  %s301_s29 = scalar_lea.vmem [#allocation5], %s1143_s3 }
  0x7a   : > { %s298_s10 = scalar_lea.sflag [#allocation6], %s297_s26 }
  0x7b   : > { %1567 = dma.done.wait (%p1985_p1), %s298_s10, 64  }
  0x7c   : > { %1569 = vsyncadd (%p1985_p1), %s298_s10, 4294967232  ;;  %p1986_p11 = scmp.eq.s32.totalorder %s1674_s25, 0 }
  0x7e   : > { %1571 = dma.done.wait (%p1986_p11), [#allocation6], 256   ;;  %p1987_p2 = pmov %p1986_p11 }
  0x80   : > { %1573 = vsyncadd (%p1987_p2), [#allocation6], 4294967040  ;;  %p1988_p4 = pmov %p1987_p2 }
  0x81   : > { %p1989_p6 = pmov %p1987_p2 }
  0x82   : > { %1575 = dma.done.wait (%p1988_p4), [#allocation9], 512  }
  0x83   : > { %1577 = vsyncadd (%p1989_p6), [#allocation9], 4294966784  ;;  %v1605_v0 = vmov 0.0   ;;  %vm1606_vm0 = vmmov 0   ;;  %v1364_v1 = vld [vmem:[#allocation8 + $0x8] sm:$0xff]   ;;  %v1365_v2 = vld [vmem:[#allocation7 + $0x8] sm:$0xff]  }
  0x84   : > { %1204 = vmatprep.subr.bf16.mxu1 %v1605_v0  ;;  %1196 = vmatprep.subr.bf16.mxu0 %v1605_v0  ;;  %v1366_v3 = vld [vmem:[#allocation8] sm:$0xff]   ;;  %v1367_v4 = vld [vmem:[#allocation7] sm:$0xff]   ;;  %v349_v5 = vld [vmem:[%s301_s29] sm:$0xf]  ;;  %vm366_vm1 = vcmask 261120   ;;  %vm471_vm2 = vcmask 64512  }
  0x85   : > { %1208 = vmatprep.mubr.msk.bf16.mxu1 %vm1606_vm0, %v1605_v0  ;;  %1200 = vmatprep.mubr.msk.bf16.mxu0 %vm1606_vm0, %v1605_v0  ;;  %v348_v6 = vld [vmem:[%s292_s19] sm:$0xf]  ;;  %s1607_s27 = smov 112   ;;  %s1608_s4 = smov 120   ;;  %vm536_vm3 = vcmask 1043456   ;;  %vm924_vm4 = vcmask 130048  }
  0x86   : > { %1205 = vmatpush3.bf16.msra.mxu1 %v1364_v1  ;;  %1197 = vmatpush3.bf16.msra.mxu0 %v1365_v2  ;;  %s1609_s14 = smov 104   ;;  %s1610_s16 = smov 96   ;;  %vm926_vm5 = vcmask 195584  }
  0x87   : > { %1206 = vmatprep.subr.bf16.mxu1 %v1605_v0  ;;  %1198 = vmatprep.subr.bf16.mxu0 %v1605_v0  ;;  %s1611_s17 = smov 80   ;;  %s1612_s30 = smov 72  }
  0x88   : > { %s1613_s7 = smov 88   ;;  %s1614_s12 = smov 8  }
  0x89   : > { %s1615_s18 = smov 16   ;;  %s1616_s20 = smov 24  }
  0x8a   : > { %1207 = vmatpush3.bf16.msra.mxu1 %v1366_v3  ;;  %1199 = vmatpush3.bf16.msra.mxu0 %v1367_v4  ;;  %s1148_s8 = sshll.u32 %s1813_s2, 3  ;;  %s1168_s19 = sshll.u32 %s1674_s25, 7 }
  0x8b   : > { %1218 = vmatprep.subr.bf16.mxu1 %v1605_v0  ;;  %1212 = vmatprep.subr.bf16.mxu0 %v1605_v0  ;;  %s346_s26 = scalar_lea.vmem [#allocation11], %s1148_s8  ;;  %p1990_p0 = scmp.ne.s32.totalorder %s1982_s13, 0 }
  0x8c   : > { %s1011_s10 = sshll.u32 %s346_s26, 4  ;;  %s1918_s10 = int_to_ptr.vmem [resolvable:$true] %s1011_s10 }
  0x8d   : > { %1209 = vmatmul.mubr.msk.bf16.vlgmr.msra.gmra.mxu1 %vm366_vm1, %v349_v5  ;;  %1201 = vmatmul.mubr.msk.bf16.vlgmr.msra.gmra.mxu0 %vm366_vm1, %v348_v6  ;;  %s1520_s25 = scalar_lea.vmem %s1918_s10, 128 }
  0x8e   : > { %1220 = vmatprep.mubr.msk.bf16.mxu1 %vm1606_vm0, %v1605_v0  ;;  %1214 = vmatprep.mubr.msk.bf16.mxu0 %vm1606_vm0, %v1605_v0  ;;  %p1521_p12 = scmp.ne.s32.totalorder %s1918_s10, %s1520_s25 }
  0x90   : > { %p1522_p5 = pnand %p1521_p12, %p1990_p0 }
  0x92   : > { %p1523_p3 = pneg %p1522_p5 }
 0x14d   : > { %v463_v7 = vpop.f32.mrf.mxu1  ;;  %v404_v9 = vpop.f32.mrf.mxu0 }
 0x14e   : > { %v1850_v8 = vpack.c.bf16 %v463_v7, %v463_v7  ;;  %v469_v11 = vpack.c.bf16 %v404_v9, %v404_v9 }
 0x14f   : > { %v1210_v10 = vpop.f32.mrf.mxu1  ;;  %v1202_v12 = vpop.f32.mrf.mxu0 }
 0x150   : > { %693 = vrot.lane.b32.xlu1 %v1850_v8, %s1607_s27  ;;  %583 = vrot.lane.b32.xlu0 %v1850_v8, %s1608_s4  ;;  %v476_v13 = vsel %vm471_vm2, %v1850_v8, 0 }
 0x151   : > { %v466_v14 = vpop.f32.mrf.mxu1  ;;  %1213 = vmatpush3.bf16.xpose.msra.mxu0 %v476_v13  ;;  %v407_v15 = vpop.f32.mrf.mxu0 }
 0x152   : > { %1224 = vmatprep.subr.bf16.mxu0 %v1605_v0 }
 0x153   : > { %v1211_v16 = vpop.f32.mrf.mxu1  ;;  %v1203_v17 = vpop.f32.mrf.mxu0 }
 0x154   : > { %691 = vrot.lane.b32.xlu1 %v469_v11, %s1607_s27  ;;  %581 = vrot.lane.b32.xlu0 %v469_v11, %s1608_s4  ;;  %s1916_s4 = scalar_lea.hbm %s1966_s6, %s1168_s19 }
 0x158   : > { %801 = vrot.lane.b32.xlu1 %v469_v11, %s1609_s14  ;;  %803 = vrot.lane.b32.xlu0 %v1850_v8, %s1609_s14  ;;  %s998_s14 = scalar_lea.sflag [#allocation4], %s1813_s2 }
 0x159   : > { %1215 = vmatmul.mubr.msk.bf16.vlgmr.msra.gmra.mxu0 %vm471_vm2, %v469_v11 }
 0x15a   : > { %1226 = vmatprep.mubr.msk.bf16.mxu0 %vm1606_vm0, %v1605_v0 }
 0x1c2   : > { %v584_v18 = vpop.permute.xlu0 %583  ;;  %v694_v20 = vpop.permute.xlu1 %693 }
 0x1c3   : > { %v589_v19 = vsel %vm471_vm2, %v584_v18, 0  ;;  %v699_v22 = vsel %vm471_vm2, %v694_v20, 0 }
 0x1c4   : > { %1225 = vmatpush3.bf16.xpose.msra.mxu0 %v589_v19 }
 0x1c5   : > { %1236 = vmatprep.subr.bf16.mxu0 %v1605_v0 }
 0x1c6   : > { %v582_v21 = vpop.permute.xlu0 %581  ;;  %v692_v24 = vpop.permute.xlu1 %691 }
 0x1ca   : > { %v804_v23 = vpop.permute.xlu0 %803  ;;  %v802_v26 = vpop.permute.xlu1 %801 }
 0x1cb   : > { %1227 = vmatmul.mubr.msk.bf16.vlgmr.msra.gmra.mxu0 %vm471_vm2, %v582_v21  ;;  %v809_v25 = vsel %vm471_vm2, %v804_v23, 0 }
 0x1cc   : > { %1237 = vmatpush3.bf16.xpose.msra.mxu0 %v699_v22  ;;  %1238 = vmatprep.mubr.msk.bf16.mxu0 %vm1606_vm0, %v1605_v0 }
 0x1cd   : > { %1248 = vmatprep.subr.bf16.mxu0 %v1605_v0 }
 0x1d3   : > { %1239 = vmatmul.mubr.msk.bf16.vlgmr.msra.gmra.mxu0 %vm471_vm2, %v692_v24 }
 0x1d4   : > { %1249 = vmatpush3.bf16.xpose.msra.mxu0 %v809_v25  ;;  %1250 = vmatprep.mubr.msk.bf16.mxu0 %vm1606_vm0, %v1605_v0 }
 0x1d5   : > { %1260 = vmatprep.subr.bf16.mxu0 %v1605_v0 }
 0x1db   : > { %1251 = vmatmul.mubr.msk.bf16.vlgmr.msra.gmra.mxu0 %vm471_vm2, %v802_v26 }
 0x1dc   : > { %1264 = vmatprep.mubr.msk.bf16.mxu0 %vm1606_vm0, %v1605_v0 }
 0x219   : > { %v512_v27 = vpop.f32.mrf.mxu0 }
 0x21a   : > { %v518_v28 = vsel %vm471_vm2, %v512_v27, -inf }
 0x21b   : > { %519 = vmax.xlane.f32.xlu0 %v518_v28  ;;  %v1216_v29 = vpop.f32.mrf.mxu0 }
 0x21d   : > { %v515_v30 = vpop.f32.mrf.mxu0 }
 0x21f   : > { %v1217_v31 = vpop.f32.mrf.mxu0 }
 0x28b   : > { %v625_v32 = vpop.f32.mrf.mxu0 }
 0x28c   : > { %v631_v33 = vsel %vm471_vm2, %v625_v32, -inf }
 0x28d   : > { %632 = vmax.xlane.f32.xlu1 %v631_v33  ;;  %v1228_v34 = vpop.f32.mrf.mxu0 }
 0x28f   : > { %v628_v35 = vpop.f32.mrf.mxu0 }
 0x290   : > { %v1369_v35 = vld [vmem:[#allocation10] sm:$0xff]  }
 0x291   : > { %v1229_v36 = vpop.f32.mrf.mxu0 }
 0x293   : > { %v735_v37 = vpop.f32.mrf.mxu0 }
 0x294   : > { %v741_v38 = vsel %vm471_vm2, %v735_v37, -inf }
 0x295   : > { %742 = vmax.xlane.f32.xlu0 %v741_v38  ;;  %v1240_v39 = vpop.f32.mrf.mxu0 }
 0x297   : > { %v738_v40 = vpop.f32.mrf.mxu0 }
 0x299   : > { %v1241_v41 = vpop.f32.mrf.mxu0 }
 0x29b   : > { %v845_v42 = vpop.f32.mrf.mxu0 }
 0x29c   : > { %v851_v43 = vsel %vm471_vm2, %v845_v42, -inf }
 0x29d   : > { %852 = vmax.xlane.f32.xlu0 %v851_v43  ;;  %v1252_v44 = vpop.f32.mrf.mxu0 }
 0x29f   : > { %v848_v45 = vpop.f32.mrf.mxu0 }
 0x2a1   : > { %v1253_v46 = vpop.f32.mrf.mxu0 }
 0x2a4   : > { %v520_v47 = vpop.xlane.xlu0 %519 }
 0x2a5   : > { %v521_v48 = vsub.f32 %v512_v27, %v520_v47 }
 0x2a7   : > { %v522_v49 = vmul.f32 1.442695, %v521_v48 }
 0x2a9   : > { %1370 = vpow2.f32 %v522_v49 }
 0x2b6   : > { %v1371_v50 = vpop.eup %1370 }
 0x2b7   : > { %v524_v51 = vsel %vm471_vm2, %v1371_v50, 0.0 }
 0x2b8   : > { %525 = vadd.xlane.f32.xlu1 %v524_v51 }
 0x2c9   : > { %531 = vrot.lane.b32.xlu1 %v1850_v8, %s1610_s16  ;;  %s1617_s16 = smov [#allocation11]  }
 0x316   : > { %v633_v52 = vpop.xlane.xlu1 %632 }
 0x317   : > { %v634_v53 = vsub.f32 %v625_v32, %v633_v52  ;;  %v1368_v32 = vld [vmem:[#allocation10 + $0x8] sm:$0xff]   ;;  %v1166_v52 = vld [vmem:[%s1965_s5] ss:$0 sm:$0xff] }
 0x318   : > { %1261 = vmatpush3.bf16.msra.mxu0 %v1368_v32 }
 0x319   : > { %v635_v54 = vmul.f32 1.442695, %v634_v53  ;;  %1262 = vmatprep.subr.bf16.mxu0 %v1605_v0 }
 0x31b   : > { %1372 = vpow2.f32 %v635_v54 }
 0x31c   : > { %1263 = vmatpush3.bf16.msra.mxu0 %v1369_v35 }
 0x31e   : > { %v743_v55 = vpop.xlane.xlu0 %742 }
 0x31f   : > { %v744_v56 = vsub.f32 %v735_v37, %v743_v55 }
 0x321   : > { %v745_v57 = vmul.f32 1.442695, %v744_v56 }
 0x323   : > { %1374 = vpow2.f32 %v745_v57 }
 0x326   : > { %v853_v58 = vpop.xlane.xlu0 %852 }
 0x327   : > { %v854_v59 = vsub.f32 %v845_v42, %v853_v58 }
 0x328   : > { %v1373_v60 = vpop.eup %1372 }
 0x329   : > { %v855_v61 = vmul.f32 1.442695, %v854_v59  ;;  %v637_v62 = vsel %vm471_vm2, %v1373_v60, 0.0 }
 0x32a   : > { %638 = vadd.xlane.f32.xlu0 %v637_v62 }
 0x32b   : > { %1376 = vpow2.f32 %v855_v61 }
 0x330   : > { %v1375_v63 = vpop.eup %1374 }
 0x331   : > { %v747_v1 = vsel %vm471_vm2, %v1375_v63, 0.0 }
 0x332   : > { %748 = vadd.xlane.f32.xlu1 %v747_v1 }
 0x338   : > { %v1377_v2 = vpop.eup %1376 }
 0x339   : > { %v857_v3 = vsel %vm471_vm2, %v1377_v2, 0.0 }
 0x33a   : > { %858 = vadd.xlane.f32.xlu0 %v857_v3 }
 0x341   : > { %v526_v4 = vpop.xlane.xlu1 %525 }
 0x342   : > { %1378 = vrcp.f32 %v526_v4 }
 0x343   : > { %753 = vrot.lane.b32.xlu1 %v1850_v8, %s1611_s17  ;;  %s1524_s17 = sshll.u32 %s1617_s16, 4  ;;  %s1525_s17 = int_to_ptr.vmem [resolvable:$false] %s1524_s17 }
 0x344   : > { %p1527_p7 = scmp.lt.s32.totalorder %s1918_s10, %s1525_s17 }
 0x345   : > { %v532_v5 = vpop.permute.xlu1 %531 }
 0x346   : > { %v538_v6 = vsel %vm536_vm3, %v532_v5, 0 }
 0x347   : > { %1219 = vmatpush3.bf16.msra.mxu1 %v538_v6  ;;  %863 = vrot.lane.b32.xlu1 %v1850_v8, %s1612_s30  ;;  %s1526_s30 = scalar_lea.vmem %s1525_s17, 256 }
 0x348   : > { %1230 = vmatprep.subr.bf16.mxu1 %v1605_v0  ;;  %p1528_p9 = scmp.lt.s32.totalorder %s1526_s30, %s1520_s25 }
 0x34a   : > { %p1529_p13 = por %p1528_p9, %p1527_p7 }
 0x34c   : > { %p1530_p8 = pnand %p1529_p13, %p1523_p3 }
 0x34f   : > { %v1379_v7 = vpop.eup %1378 }
 0x350   : > { %643 = vrot.lane.b32.xlu0 %v1850_v8, %s1613_s7  ;;  %v528_v9 = vmul.f32 %v1379_v7, %v1371_v50 }
 0x352   : > { %v529_v10 = vpack.c.bf16 %v528_v9, %v528_v9 }
 0x354   : > { %1221 = vmatmul.mubr.msk.bf16.vlgmr.msra.gmra.mxu1 %vm471_vm2, %v529_v10 }
 0x355   : > { %1232 = vmatprep.mubr.msk.bf16.mxu1 %vm1606_vm0, %v1605_v0 }
 0x3b3   : > { %v639_v11 = vpop.xlane.xlu0 %638 }
 0x3b4   : > { %1380 = vrcp.f32 %v639_v11 }
 0x3bb   : > { %v749_v12 = vpop.xlane.xlu1 %748 }
 0x3bc   : > { %1382 = vrcp.f32 %v749_v12 }
 0x3bf   : > { %v754_v18 = vpop.permute.xlu1 %753 }
 0x3c0   : > { %v759_v20 = vsel %vm536_vm3, %v754_v18, 0 }
 0x3c1   : > { %v1381_v13 = vpop.eup %1380 }
 0x3c2   : > { %v641_v15 = vmul.f32 %v1381_v13, %v1373_v60 }
 0x3c3   : > { %v859_v14 = vpop.xlane.xlu0 %858  ;;  %v864_v22 = vpop.permute.xlu1 %863 }
 0x3c4   : > { %1384 = vrcp.f32 %v859_v14  ;;  %v642_v8 = vpack.c.bf16 %v641_v15, %v641_v15  ;;  %v869_v25 = vsel %vm536_vm3, %v864_v22, 0 }
 0x3c7   : > { %v644_v16 = vpop.permute.xlu0 %643 }
 0x3c8   : > { %v649_v17 = vsel %vm536_vm3, %v644_v16, 0 }
 0x3c9   : > { %1231 = vmatpush3.bf16.msra.mxu1 %v649_v17  ;;  %v1383_v19 = vpop.eup %1382 }
 0x3ca   : > { %1242 = vmatprep.subr.bf16.mxu1 %v1605_v0  ;;  %v751_v21 = vmul.f32 %v1383_v19, %v1375_v63 }
 0x3cc   : > { %1233 = vmatmul.mubr.msk.bf16.vlgmr.msra.gmra.mxu1 %vm471_vm2, %v642_v8  ;;  %v752_v23 = vpack.c.bf16 %v751_v21, %v751_v21 }
 0x3cd   : > { %1243 = vmatpush3.bf16.msra.mxu1 %v759_v20  ;;  %1244 = vmatprep.mubr.msk.bf16.mxu1 %vm1606_vm0, %v1605_v0 }
 0x3ce   : > { %1254 = vmatprep.subr.bf16.mxu1 %v1605_v0 }
 0x3d1   : > { %v1385_v24 = vpop.eup %1384 }
 0x3d2   : > { %v861_v26 = vmul.f32 %v1385_v24, %v1377_v2 }
 0x3d4   : > { %1245 = vmatmul.mubr.msk.bf16.vlgmr.msra.gmra.mxu1 %vm471_vm2, %v752_v23  ;;  %v862_v27 = vpack.c.bf16 %v861_v26, %v861_v26 }
 0x3d5   : > { %1255 = vmatpush3.bf16.msra.mxu1 %v869_v25  ;;  %1256 = vmatprep.mubr.msk.bf16.mxu1 %vm1606_vm0, %v1605_v0 }
 0x3dc   : > { %1257 = vmatmul.mubr.msk.bf16.vlgmr.msra.gmra.mxu1 %vm471_vm2, %v862_v27 }
 0x414   : > { %v574_v28 = vpop.f32.mrf.mxu1 }
 0x416   : > { %v1222_v29 = vpop.f32.mrf.mxu1 }
 0x418   : > { %v577_v30 = vpop.f32.mrf.mxu1 }
 0x41a   : > { %v1223_v31 = vpop.f32.mrf.mxu1 }
 0x48c   : > { %v685_v33 = vpop.f32.mrf.mxu1 }
 0x48d   : > { %912 = vrot.lane.b32.xlu0 %v685_v33, %s1614_s12 }
 0x48e   : > { %v1234_v34 = vpop.f32.mrf.mxu1 }
 0x490   : > { %v688_v36 = vpop.f32.mrf.mxu1 }
 0x492   : > { %v1235_v37 = vpop.f32.mrf.mxu1 }
 0x494   : > { %v795_v38 = vpop.f32.mrf.mxu1 }
 0x495   : > { %916 = vrot.lane.b32.xlu1 %v795_v38, %s1615_s18 }
 0x496   : > { %v1246_v39 = vpop.f32.mrf.mxu1 }
 0x498   : > { %v798_v40 = vpop.f32.mrf.mxu1 }
 0x49a   : > { %v1247_v41 = vpop.f32.mrf.mxu1 }
 0x49c   : > { %v905_v42 = vpop.f32.mrf.mxu1 }
 0x49d   : > { %920 = vrot.lane.b32.xlu0 %v905_v42, %s1616_s20 }
 0x49e   : > { %v1258_v0 = vpop.f32.mrf.mxu1 }
 0x4a0   : > { %v908_v43 = vpop.f32.mrf.mxu1 }
 0x4a2   : > { %v1259_v44 = vpop.f32.mrf.mxu1 }
 0x4ff   : > { %v913_v45 = vpop.permute.xlu0 %912 }
 0x500   : > { %v923_v47 = vsel %vm471_vm2, %v574_v28, %v913_v45 }
 0x507   : > { %v917_v46 = vpop.permute.xlu1 %916 }
 0x508   : > { %v925_v48 = vsel %vm924_vm4, %v923_v47, %v917_v46 }
 0x50f   : > { %v921_v49 = vpop.permute.xlu0 %920 }
 0x510   : > { %v927_v50 = vsel %vm926_vm5, %v925_v48, %v921_v49 }
 0x511   : > { %v928_v51 = vpack.c.bf16 %v927_v50, %v927_v50 }
 0x513   : > { %1265 = vmatmul.mubr.msk.bf16.vlgmr.msra.gmra.mxu0 %vm366_vm1, %v928_v51 }
 0x5d3   : > { %v982_v53 = vpop.f32.mrf.mxu0 }
 0x5d4   : > { %v995_v54 = vadd.f32 %v1166_v52, %v982_v53 }
 0x5d5   : > { %v1266_v55 = vpop.f32.mrf.mxu0 }
 0x5d6   : > { %996 = vst.msk [vmem:[%s346_s26] sm:$0xff] %vm366_vm1, %v995_v54 }
 0x5d7   : > { %v985_v56 = vpop.f32.mrf.mxu0 }
 0x5d8   : > { %1533 = shalt.err (!%p1530_p8)
}
 0x5d9   : > { %s1534_s7 = scalar_lea.hbm %s1916_s4, 128  ;;  %s1538_s18 = scalar_lea.hbm %s1966_s6, 256 }
 0x5da   : > { %p1535_p10 = scmp.ne.s32.totalorder %s1916_s4, %s1534_s7  ;;  %p1539_p2 = scmp.lt.s32.totalorder %s1916_s4, %s1966_s6 }
 0x5db   : > { %p1540_p4 = scmp.lt.s32.totalorder %s1538_s18, %s1534_s7 }
 0x5dc   : > { %p1536_p1 = pnand %p1535_p10, %p1990_p0 }
 0x5dd   : > { %p1541_p6 = por %p1540_p4, %p1539_p2 }
 0x5de   : > { %p1537_p11 = pneg %p1536_p1 }
 0x5e0   : > { %p1542_p12 = pnand %p1541_p6, %p1537_p11 }
 0x5e2   : > { %1545 = shalt.err (!%p1542_p12)
}
 0x5e3   : > { %1284 = dma.vmem_to_hbm [thread:$0]  (%p1990_p0), %s1918_s10, 128, %s1916_s4, %s998_s14   ;;  %v1267_v57 = vpop.f32.mrf.mxu0 }
 0x5e4 PF: > { %s1023_s3 = sand.u32 1, %s1584_s21   ;;  %p1991_p5 = scmp.ne.s32.totalorder %s1975_s28, 0 }
 0x5e5   : > { %p1992_p3 = scmp.ge.s32.totalorder %s1596_s24, 2  ;;  %s1024_s15 = scalar_lea.sflag [#allocation4], %s1023_s3 }
 0x5e7   : > { %p1304_p7 = pnand %p1992_p3, %p1991_p5 }
 0x5e9   : > { %p1305_p9 = pneg %p1304_p7 }
 0x5eb   : > { %1579 = dma.done.wait (%p1305_p9), %s1024_s15, 128  }
 0x5ec   : > { %1581 = vsyncadd (%p1305_p9), %s1024_s15, 4294967168  ;;  %p23_p13 = scmp.ge.s32.totalorder %s1733_s9, 4   ;;  %s1993_s21 = smov %s1588_s22 }
 0x5ed   : > { %s1994_s22 = smov %s1592_s23  ;;  %s1995_s23 = smov %s1743_s11 }
 0x5ee   : > { %s1996_s24 = smov %s1733_s9  ;;  %25 = sbr.rel (!%p23_p13) target bundleno = 12 (0xc), region = 114 }
 0x5f3   :  { %1029 = vsyncpa [#allocation3], 1 }
 0x5f4   :  { %1031 = vsyncpa [#allocation3 + $0x1], 1 }
 0x5f5   :  { %1032 = vsyncpa [#allocation6], 1 }
 0x5f6   :  { %1034 = vsyncpa [#allocation6 + $0x1], 1 }
 0x5f7   :  { %1035 = vsyncpa [#allocation9], 1 }
 0x5f8   :  { %1036 = vsyncpa [#allocation4], 1 }
 0x5f9   :  { %1038 = vsyncpa [#allocation4 + $0x1], 1 }

</bundles_post_ra>
